<compile_context>
chip_gen: v7x
topology: tpu7x:2x2x1
jax: 0.10.0
libtpu: 0.0.40
codegen_flags: <defaults>
</compile_context>

<pallas_src>
import functools

import jax
import jax.numpy as jnp
from jax.experimental import pallas as pl
from jax.experimental.pallas import tpu as pltpu


_VMEM_TILE_BUDGET = 24 * 1024 * 1024   # budget for double-buffered batch tiles
_VMEM_LIMIT = 48 * 1024 * 1024         # fits within v7x's 64 MiB physical VMEM
_MAX_TB = 4096                         # upper bound on the batch tile


def _fusion_kernel(normalize,
                   ehr_ref, cxr_ref, note_ref,
                   w_img_ref, b_img_ref, w_note_ref, b_note_ref,
                   wc_e_ref, wc_i_ref, wc_n_ref, b_cls_ref,
                   *out_refs):
    if normalize:
        ehr_out_ref, img_out_ref, note_out_ref, fused_out_ref = out_refs
    else:
        img_out_ref, note_out_ref, fused_out_ref = out_refs
        ehr_out_ref = None

    # Projections (nn.Linear: x @ W + b, W stored (in, out)). Native-dtype MXU
    # inputs, f32 accumulation.
    proj_img = (jnp.dot(cxr_ref[...], w_img_ref[...],
                        preferred_element_type=jnp.float32)
                + b_img_ref[...].astype(jnp.float32))
    proj_note = (jnp.dot(note_ref[...], w_note_ref[...],
                         preferred_element_type=jnp.float32)
                 + b_note_ref[...].astype(jnp.float32))

    if normalize:  # F.normalize(p=2, dim=1, eps=1e-12)
        def l2norm(v):
            nrm2 = jnp.sum(v * v, axis=1, keepdims=True)
            # rsqrt(max(|v|^2, eps^2)) == 1 / max(|v|, eps)  -> single EUP op.
            return v * jax.lax.rsqrt(jnp.maximum(nrm2, 1e-24))
        ehr = l2norm(ehr_ref[...].astype(jnp.float32))
        proj_img = l2norm(proj_img)
        proj_note = l2norm(proj_note)
        ehr_mxu = ehr.astype(wc_e_ref.dtype)
    else:
        # Feed ehr to the MXU in its native dtype (no VALU up-cast needed).
        ehr_mxu = ehr_ref[...]

    # Fused classifier as three split K=D matmuls on the pre-split weight
    # (algebraically identical to cat([ehr, img, note], dim=1) @ W_cls + b).
    logits = (jnp.dot(ehr_mxu, wc_e_ref[...],
                      preferred_element_type=jnp.float32)
              + jnp.dot(proj_img.astype(wc_i_ref.dtype), wc_i_ref[...],
                        preferred_element_type=jnp.float32)
              + jnp.dot(proj_note.astype(wc_n_ref.dtype), wc_n_ref[...],
                        preferred_element_type=jnp.float32)
              + b_cls_ref[...].astype(jnp.float32))
    fused = jax.nn.sigmoid(logits)

    # Direct stores to separate outputs (no lane-axis concat, no packed slab).
    if normalize:
        ehr_out_ref[...] = ehr.astype(ehr_out_ref.dtype)
    img_out_ref[...] = proj_img.astype(img_out_ref.dtype)
    note_out_ref[...] = proj_note.astype(note_out_ref.dtype)
    fused_out_ref[...] = fused.astype(fused_out_ref.dtype)


def _pick_tb(B, in_cols, out_cols, in_itemsize, out_itemsize):
    """Batch tile from a VMEM budget; multiple of 8; grid >= 2 when possible."""
    if B <= 8:
        return B
    per_row = 2 * in_cols * in_itemsize + 2 * out_cols * out_itemsize  # dbl-buffered
    tb_budget = max(8, _VMEM_TILE_BUDGET // max(per_row, 1))
    tb_two = ((((B + 1) // 2) + 7) // 8) * 8   # ensure >= 2 grid steps (v7x megacore)
    tb = min(_MAX_TB, tb_budget, tb_two, ((B + 7) // 8) * 8)
    return max(8, (tb // 8) * 8)


def copula_fusion_forward(ehr_feats, cxr_feats, note_feats, params,
                          normalize=True, out_dtype=None):
    """Pallas implementation of Copula_Fusion.forward (copula_fuse_type != 'lstm')."""
    B, D = ehr_feats.shape
    P = cxr_feats.shape[1]
    w_cls = params["w_cls"]                      # (3D, C), already (in, out)
    C = w_cls.shape[-1]
    if out_dtype is None:
        out_dtype = ehr_feats.dtype              # pass out_dtype=jnp.bfloat16 to halve writes

    # Statically pre-split the classifier weight -> three resident (D, C) blocks.
    wc_e, wc_i, wc_n = w_cls[:D], w_cls[D:2 * D], w_cls[2 * D:3 * D]

    n_feat_outs = 3 if normalize else 2          # ehr passthrough skipped when not normalizing
    TB = _pick_tb(B, D + 2 * P, n_feat_outs * D + C,
                  jnp.dtype(ehr_feats.dtype).itemsize,
                  jnp.dtype(out_dtype).itemsize)
    grid = (pl.cdiv(B, TB),)

    feat_spec = pl.BlockSpec((TB, D), lambda i: (i, 0))
    cls_spec = pl.BlockSpec((TB, C), lambda i: (i, 0))
    out_shape = tuple([jax.ShapeDtypeStruct((B, D), out_dtype)] * n_feat_outs
                      + [jax.ShapeDtypeStruct((B, C), out_dtype)])
    out_specs = tuple([feat_spec] * n_feat_outs + [cls_spec])

    kernel = functools.partial(_fusion_kernel, normalize)

    outs = pl.pallas_call(
        kernel,
        grid=grid,
        out_shape=out_shape,
        in_specs=[
            pl.BlockSpec((TB, D), lambda i: (i, 0)),     # ehr feats   (tiled)
            pl.BlockSpec((TB, P), lambda i: (i, 0)),     # cxr feats   (tiled)
            pl.BlockSpec((TB, P), lambda i: (i, 0)),     # note feats  (tiled)
            pl.BlockSpec((P, D), lambda i: (0, 0)),      # w_img       (resident)
            pl.BlockSpec((1, D), lambda i: (0, 0)),      # b_img       (resident)
            pl.BlockSpec((P, D), lambda i: (0, 0)),      # w_note      (resident)
            pl.BlockSpec((1, D), lambda i: (0, 0)),      # b_note      (resident)
            pl.BlockSpec((D, C), lambda i: (0, 0)),      # w_cls[:D]   (resident)
            pl.BlockSpec((D, C), lambda i: (0, 0)),      # w_cls[D:2D] (resident)
            pl.BlockSpec((D, C), lambda i: (0, 0)),      # w_cls[2D:]  (resident)
            pl.BlockSpec((1, C), lambda i: (0, 0)),      # b_cls       (resident)
        ],
        out_specs=out_specs,
        compiler_params=pltpu.CompilerParams(
            dimension_semantics=("parallel",),
            vmem_limit_bytes=_VMEM_LIMIT,
        ),
    )(ehr_feats, cxr_feats, note_feats,
      params["w_img"], params["b_img"],
      params["w_note"], params["b_note"],
      wc_e, wc_i, wc_n, params["b_cls"])

    if normalize:
        ehr_n, proj_img, proj_note, fused = outs
    else:
        proj_img, proj_note, fused = outs
        ehr_n = ehr_feats            # passthrough: no kernel write / extra HBM traffic

    # TODO(synk): Copula3DLoss / CosineLoss / KLDivLoss class definitions are not
    # provided in the reference module, so copula_loss is a placeholder scalar.
    copula_loss = jnp.float32(0.0)

    return {
        "ehr_feats": ehr_n,        # (possibly normalized) ehr features
        "cxr_feats": proj_img,     # projected image features (matches PyTorch return)
        "copula": fused,           # fused sigmoid predictions
        "copula_loss": copula_loss,
        "note_feats": proj_note,   # extra output (used only inside the torch fwd)
    }


def _reference_forward(ehr, cxr, note, params, normalize=True):
    """Pure-JAX reference for correctness checking."""
    proj_img = cxr @ params["w_img"] + params["b_img"]
    proj_note = note @ params["w_note"] + params["b_note"]
    if normalize:
        def l2norm(v):
            return v / jnp.maximum(jnp.linalg.norm(v, axis=1, keepdims=True), 1e-12)
        ehr, proj_img, proj_note = l2norm(ehr), l2norm(proj_img), l2norm(proj_note)
    feats = jnp.concatenate([ehr, proj_img, proj_note], axis=1)
    fused = jax.nn.sigmoid(feats @ params["w_cls"] + params["b_cls"])
    return ehr, proj_img, proj_note, fused


if __name__ == "__main__":
    # Small shapes consistent with the module:
    #   B = batch, D = ehr_model.feats_dim (lstm_in), P = cxr_model.feats_dim
    #   C = num_classes
    B, D, P, C = 8, 32, 64, 4

    key = jax.random.PRNGKey(0)
    k = jax.random.split(key, 9)

    ehr_feats = jax.random.normal(k[0], (B, D), jnp.float32)
    cxr_feats = jax.random.normal(k[1], (B, P), jnp.float32)
    note_feats = jax.random.normal(k[2], (B, P), jnp.float32)

    # Synthetic parameters (shapes from __init__):
    #   projection_img / projection_note : Linear(P -> D)
    #   fused_cls                        : Linear(3D -> C) + Sigmoid
    # Weights stored transposed vs. PyTorch: (in, out).
    scale_p = 1.0 / jnp.sqrt(jnp.float32(P))
    scale_f = 1.0 / jnp.sqrt(jnp.float32(3 * D))
    params = {
        "w_img": jax.random.uniform(k[3], (P, D), jnp.float32, -scale_p, scale_p),
        "b_img": jax.random.uniform(k[4], (1, D), jnp.float32, -scale_p, scale_p),
        "w_note": jax.random.uniform(k[5], (P, D), jnp.float32, -scale_p, scale_p),
        "b_note": jax.random.uniform(k[6], (1, D), jnp.float32, -scale_p, scale_p),
        "w_cls": jax.random.uniform(k[7], (3 * D, C), jnp.float32, -scale_f, scale_f),
        "b_cls": jax.random.uniform(k[8], (1, C), jnp.float32, -scale_f, scale_f),
    }

    ok = True
    for norm in (True, False):
        out = copula_fusion_forward(ehr_feats, cxr_feats, note_feats, params,
                                    normalize=norm)
        jax.block_until_ready(out)

        ref_ehr, ref_img, ref_note, ref_fused = _reference_forward(
            ehr_feats, cxr_feats, note_feats, params, normalize=norm)
        ok &= bool(jnp.allclose(out["ehr_feats"], ref_ehr, atol=1e-5))
        ok &= bool(jnp.allclose(out["cxr_feats"], ref_img, atol=1e-5))
        ok &= bool(jnp.allclose(out["note_feats"], ref_note, atol=1e-5))
        ok &= bool(jnp.allclose(out["copula"], ref_fused, atol=1e-5))

    assert ok
    print("KERNEL_OK")
</pallas_src>

<mosaic_0001>
module attributes {stable_mosaic.version = 11 : i64} {
  func.func @_fusion_kernel(%arg0: i32, %arg1: memref<8x32xf32, #tpu.memory_space<vmem>>, %arg2: memref<8x64xf32, #tpu.memory_space<vmem>>, %arg3: memref<8x64xf32, #tpu.memory_space<vmem>>, %arg4: memref<64x32xf32, #tpu.memory_space<vmem>>, %arg5: memref<1x32xf32, #tpu.memory_space<vmem>>, %arg6: memref<64x32xf32, #tpu.memory_space<vmem>>, %arg7: memref<1x32xf32, #tpu.memory_space<vmem>>, %arg8: memref<32x4xf32, #tpu.memory_space<vmem>>, %arg9: memref<32x4xf32, #tpu.memory_space<vmem>>, %arg10: memref<32x4xf32, #tpu.memory_space<vmem>>, %arg11: memref<1x4xf32, #tpu.memory_space<vmem>>, %arg12: memref<8x32xf32, #tpu.memory_space<vmem>>, %arg13: memref<8x32xf32, #tpu.memory_space<vmem>>, %arg14: memref<8x32xf32, #tpu.memory_space<vmem>>, %arg15: memref<8x4xf32, #tpu.memory_space<vmem>>) attributes {dimension_semantics = [#tpu.dimension_semantics<parallel>], iteration_bounds = array<i64: 1>, scalar_prefetch = 0 : i64, scratch_operands = 0 : i64, tpu.core_type = #tpu.core_type<tc>, window_params = [{transform_indices = @transform_0, window_bounds = array<i64: 8, 32>}, {transform_indices = @transform_1, window_bounds = array<i64: 8, 64>}, {transform_indices = @transform_2, window_bounds = array<i64: 8, 64>}, {pipeline_mode = #tpu.pipeline_mode<synchronous>, transform_indices = @transform_3, window_bounds = array<i64: 64, 32>}, {pipeline_mode = #tpu.pipeline_mode<synchronous>, transform_indices = @transform_4, window_bounds = array<i64: 1, 32>}, {pipeline_mode = #tpu.pipeline_mode<synchronous>, transform_indices = @transform_5, window_bounds = array<i64: 64, 32>}, {pipeline_mode = #tpu.pipeline_mode<synchronous>, transform_indices = @transform_6, window_bounds = array<i64: 1, 32>}, {pipeline_mode = #tpu.pipeline_mode<synchronous>, transform_indices = @transform_7, window_bounds = array<i64: 32, 4>}, {pipeline_mode = #tpu.pipeline_mode<synchronous>, transform_indices = @transform_8, window_bounds = array<i64: 32, 4>}, {pipeline_mode = #tpu.pipeline_mode<synchronous>, transform_indices = @transform_9, window_bounds = array<i64: 32, 4>}, {pipeline_mode = #tpu.pipeline_mode<synchronous>, transform_indices = @transform_10, window_bounds = array<i64: 1, 4>}, {transform_indices = @transform_11, window_bounds = array<i64: 8, 32>}, {transform_indices = @transform_12, window_bounds = array<i64: 8, 32>}, {transform_indices = @transform_13, window_bounds = array<i64: 8, 32>}, {transform_indices = @transform_14, window_bounds = array<i64: 8, 4>}]} {
    %c0 = arith.constant 0 : index
    %c0_0 = arith.constant 0 : index
    %0 = vector.load %arg2[%c0, %c0_0] : memref<8x64xf32, #tpu.memory_space<vmem>>, vector<8x64xf32>
    %c0_1 = arith.constant 0 : index
    %c0_2 = arith.constant 0 : index
    %1 = vector.load %arg4[%c0_1, %c0_2] : memref<64x32xf32, #tpu.memory_space<vmem>>, vector<64x32xf32>
    %cst = arith.constant dense<0.000000e+00> : vector<8x32xf32>
    %2 = tpu.matmul %0, %1, %cst {dimension_numbers = #tpu.dot_dimension_numbers<[1], [0], [0], [1], [0, 0, 1, 1], [], []>} : vector<8x64xf32>, vector<64x32xf32>, vector<8x32xf32> -> vector<8x32xf32>
    %c0_3 = arith.constant 0 : index
    %c0_4 = arith.constant 0 : index
    %3 = vector.load %arg5[%c0_3, %c0_4] : memref<1x32xf32, #tpu.memory_space<vmem>>, vector<1x32xf32>
    %4 = vector.broadcast %3 : vector<1x32xf32> to vector<8x32xf32>
    %5 = arith.addf %2, %4 : vector<8x32xf32>
    %c0_5 = arith.constant 0 : index
    %c0_6 = arith.constant 0 : index
    %6 = vector.load %arg3[%c0_5, %c0_6] : memref<8x64xf32, #tpu.memory_space<vmem>>, vector<8x64xf32>
    %c0_7 = arith.constant 0 : index
    %c0_8 = arith.constant 0 : index
    %7 = vector.load %arg6[%c0_7, %c0_8] : memref<64x32xf32, #tpu.memory_space<vmem>>, vector<64x32xf32>
    %cst_9 = arith.constant dense<0.000000e+00> : vector<8x32xf32>
    %8 = tpu.matmul %6, %7, %cst_9 {dimension_numbers = #tpu.dot_dimension_numbers<[1], [0], [0], [1], [0, 0, 1, 1], [], []>} : vector<8x64xf32>, vector<64x32xf32>, vector<8x32xf32> -> vector<8x32xf32>
    %c0_10 = arith.constant 0 : index
    %c0_11 = arith.constant 0 : index
    %9 = vector.load %arg7[%c0_10, %c0_11] : memref<1x32xf32, #tpu.memory_space<vmem>>, vector<1x32xf32>
    %10 = vector.broadcast %9 : vector<1x32xf32> to vector<8x32xf32>
    %11 = arith.addf %8, %10 : vector<8x32xf32>
    %c0_12 = arith.constant 0 : index
    %c0_13 = arith.constant 0 : index
    %12 = vector.load %arg1[%c0_12, %c0_13] : memref<8x32xf32, #tpu.memory_space<vmem>>, vector<8x32xf32>
    %13 = arith.mulf %12, %12 : vector<8x32xf32>
    %cst_14 = arith.constant dense<0.000000e+00> : vector<8xf32>
    %14 = vector.multi_reduction <add>, %13, %cst_14 [1] : vector<8x32xf32> to vector<8xf32>
    %15 = vector.shape_cast %14 : vector<8xf32> to vector<8x1xf32>
    %cst_15 = arith.constant 1.000000e-24 : f32
    %16 = vector.broadcast %cst_15 : f32 to vector<8x1xf32>
    %17 = arith.maximumf %15, %16 : vector<8x1xf32>
    %18 = math.rsqrt %17 : vector<8x1xf32>
    %19 = vector.broadcast %18 : vector<8x1xf32> to vector<8x32xf32>
    %20 = arith.mulf %12, %19 : vector<8x32xf32>
    %21 = arith.mulf %5, %5 : vector<8x32xf32>
    %cst_16 = arith.constant dense<0.000000e+00> : vector<8xf32>
    %22 = vector.multi_reduction <add>, %21, %cst_16 [1] : vector<8x32xf32> to vector<8xf32>
    %23 = vector.shape_cast %22 : vector<8xf32> to vector<8x1xf32>
    %cst_17 = arith.constant 1.000000e-24 : f32
    %24 = vector.broadcast %cst_17 : f32 to vector<8x1xf32>
    %25 = arith.maximumf %23, %24 : vector<8x1xf32>
    %26 = math.rsqrt %25 : vector<8x1xf32>
    %27 = vector.broadcast %26 : vector<8x1xf32> to vector<8x32xf32>
    %28 = arith.mulf %5, %27 : vector<8x32xf32>
    %29 = arith.mulf %11, %11 : vector<8x32xf32>
    %cst_18 = arith.constant dense<0.000000e+00> : vector<8xf32>
    %30 = vector.multi_reduction <add>, %29, %cst_18 [1] : vector<8x32xf32> to vector<8xf32>
    %31 = vector.shape_cast %30 : vector<8xf32> to vector<8x1xf32>
    %cst_19 = arith.constant 1.000000e-24 : f32
    %32 = vector.broadcast %cst_19 : f32 to vector<8x1xf32>
    %33 = arith.maximumf %31, %32 : vector<8x1xf32>
    %34 = math.rsqrt %33 : vector<8x1xf32>
    %35 = vector.broadcast %34 : vector<8x1xf32> to vector<8x32xf32>
    %36 = arith.mulf %11, %35 : vector<8x32xf32>
    %c0_20 = arith.constant 0 : index
    %c0_21 = arith.constant 0 : index
    %37 = vector.load %arg8[%c0_20, %c0_21] : memref<32x4xf32, #tpu.memory_space<vmem>>, vector<32x4xf32>
    %cst_22 = arith.constant dense<0.000000e+00> : vector<8x4xf32>
    %38 = tpu.matmul %20, %37, %cst_22 {dimension_numbers = #tpu.dot_dimension_numbers<[1], [0], [0], [1], [0, 0, 1, 1], [], []>} : vector<8x32xf32>, vector<32x4xf32>, vector<8x4xf32> -> vector<8x4xf32>
    %c0_23 = arith.constant 0 : index
    %c0_24 = arith.constant 0 : index
    %39 = vector.load %arg9[%c0_23, %c0_24] : memref<32x4xf32, #tpu.memory_space<vmem>>, vector<32x4xf32>
    %cst_25 = arith.constant dense<0.000000e+00> : vector<8x4xf32>
    %40 = tpu.matmul %28, %39, %cst_25 {dimension_numbers = #tpu.dot_dimension_numbers<[1], [0], [0], [1], [0, 0, 1, 1], [], []>} : vector<8x32xf32>, vector<32x4xf32>, vector<8x4xf32> -> vector<8x4xf32>
    %41 = arith.addf %38, %40 : vector<8x4xf32>
    %c0_26 = arith.constant 0 : index
    %c0_27 = arith.constant 0 : index
    %42 = vector.load %arg10[%c0_26, %c0_27] : memref<32x4xf32, #tpu.memory_space<vmem>>, vector<32x4xf32>
    %cst_28 = arith.constant dense<0.000000e+00> : vector<8x4xf32>
    %43 = tpu.matmul %36, %42, %cst_28 {dimension_numbers = #tpu.dot_dimension_numbers<[1], [0], [0], [1], [0, 0, 1, 1], [], []>} : vector<8x32xf32>, vector<32x4xf32>, vector<8x4xf32> -> vector<8x4xf32>
    %44 = arith.addf %41, %43 : vector<8x4xf32>
    %c0_29 = arith.constant 0 : index
    %c0_30 = arith.constant 0 : index
    %45 = vector.load %arg11[%c0_29, %c0_30] : memref<1x4xf32, #tpu.memory_space<vmem>>, vector<1x4xf32>
    %46 = vector.broadcast %45 : vector<1x4xf32> to vector<8x4xf32>
    %47 = arith.addf %44, %46 : vector<8x4xf32>
    %48 = arith.negf %47 : vector<8x4xf32>
    %49 = math.exp %48 : vector<8x4xf32>
    %cst_31 = arith.constant 1.000000e+00 : f32
    %50 = vector.broadcast %cst_31 : f32 to vector<8x4xf32>
    %51 = arith.addf %50, %49 : vector<8x4xf32>
    %52 = arith.divf %50, %51 : vector<8x4xf32>
    %c0_32 = arith.constant 0 : index
    %c0_33 = arith.constant 0 : index
    %53 = vector.load %arg12[%c0_32, %c0_33] : memref<8x32xf32, #tpu.memory_space<vmem>>, vector<8x32xf32>
    tpu.vector_store %arg12[%c0_32, %c0_33], %20 {strides = array<i32>} : memref<8x32xf32, #tpu.memory_space<vmem>>, vector<8x32xf32>,
    %c0_34 = arith.constant 0 : index
    %c0_35 = arith.constant 0 : index
    %54 = vector.load %arg13[%c0_34, %c0_35] : memref<8x32xf32, #tpu.memory_space<vmem>>, vector<8x32xf32>
    tpu.vector_store %arg13[%c0_34, %c0_35], %28 {strides = array<i32>} : memref<8x32xf32, #tpu.memory_space<vmem>>, vector<8x32xf32>,
    %c0_36 = arith.constant 0 : index
    %c0_37 = arith.constant 0 : index
    %55 = vector.load %arg14[%c0_36, %c0_37] : memref<8x32xf32, #tpu.memory_space<vmem>>, vector<8x32xf32>
    tpu.vector_store %arg14[%c0_36, %c0_37], %36 {strides = array<i32>} : memref<8x32xf32, #tpu.memory_space<vmem>>, vector<8x32xf32>,
    %c0_38 = arith.constant 0 : index
    %c0_39 = arith.constant 0 : index
    %56 = vector.load %arg15[%c0_38, %c0_39] : memref<8x4xf32, #tpu.memory_space<vmem>>, vector<8x4xf32>
    tpu.vector_store %arg15[%c0_38, %c0_39], %52 {strides = array<i32>} : memref<8x4xf32, #tpu.memory_space<vmem>>, vector<8x4xf32>,
    return
  }
  func.func @transform_0(%arg0: i32) -> (i32, i32) {
    %c0_i32 = arith.constant 0 : i32
    %c0_i32_0 = arith.constant 0 : i32
    return %arg0, %c0_i32 : i32, i32
  }
  func.func @transform_1(%arg0: i32) -> (i32, i32) {
    %c0_i32 = arith.constant 0 : i32
    %c0_i32_0 = arith.constant 0 : i32
    return %arg0, %c0_i32 : i32, i32
  }
  func.func @transform_2(%arg0: i32) -> (i32, i32) {
    %c0_i32 = arith.constant 0 : i32
    %c0_i32_0 = arith.constant 0 : i32
    return %arg0, %c0_i32 : i32, i32
  }
  func.func @transform_3(%arg0: i32) -> (i32, i32) {
    %c0_i32 = arith.constant 0 : i32
    %c0_i32_0 = arith.constant 0 : i32
    %c0_i32_1 = arith.constant 0 : i32
    return %c0_i32, %c0_i32_0 : i32, i32
  }
  func.func @transform_4(%arg0: i32) -> (i32, i32) {
    %c0_i32 = arith.constant 0 : i32
    %c0_i32_0 = arith.constant 0 : i32
    %c0_i32_1 = arith.constant 0 : i32
    return %c0_i32, %c0_i32_0 : i32, i32
  }
  func.func @transform_5(%arg0: i32) -> (i32, i32) {
    %c0_i32 = arith.constant 0 : i32
    %c0_i32_0 = arith.constant 0 : i32
    %c0_i32_1 = arith.constant 0 : i32
    return %c0_i32, %c0_i32_0 : i32, i32
  }
  func.func @transform_6(%arg0: i32) -> (i32, i32) {
    %c0_i32 = arith.constant 0 : i32
    %c0_i32_0 = arith.constant 0 : i32
    %c0_i32_1 = arith.constant 0 : i32
    return %c0_i32, %c0_i32_0 : i32, i32
  }
  func.func @transform_7(%arg0: i32) -> (i32, i32) {
    %c0_i32 = arith.constant 0 : i32
    %c0_i32_0 = arith.constant 0 : i32
    %c0_i32_1 = arith.constant 0 : i32
    return %c0_i32, %c0_i32_0 : i32, i32
  }
  func.func @transform_8(%arg0: i32) -> (i32, i32) {
    %c0_i32 = arith.constant 0 : i32
    %c0_i32_0 = arith.constant 0 : i32
    %c0_i32_1 = arith.constant 0 : i32
    return %c0_i32, %c0_i32_0 : i32, i32
  }
  func.func @transform_9(%arg0: i32) -> (i32, i32) {
    %c0_i32 = arith.constant 0 : i32
    %c0_i32_0 = arith.constant 0 : i32
    %c0_i32_1 = arith.constant 0 : i32
    return %c0_i32, %c0_i32_0 : i32, i32
  }
  func.func @transform_10(%arg0: i32) -> (i32, i32) {
    %c0_i32 = arith.constant 0 : i32
    %c0_i32_0 = arith.constant 0 : i32
    %c0_i32_1 = arith.constant 0 : i32
    return %c0_i32, %c0_i32_0 : i32, i32
  }
  func.func @transform_11(%arg0: i32) -> (i32, i32) {
    %c0_i32 = arith.constant 0 : i32
    %c0_i32_0 = arith.constant 0 : i32
    return %arg0, %c0_i32 : i32, i32
  }
  func.func @transform_12(%arg0: i32) -> (i32, i32) {
    %c0_i32 = arith.constant 0 : i32
    %c0_i32_0 = arith.constant 0 : i32
    return %arg0, %c0_i32 : i32, i32
  }
  func.func @transform_13(%arg0: i32) -> (i32, i32) {
    %c0_i32 = arith.constant 0 : i32
    %c0_i32_0 = arith.constant 0 : i32
    return %arg0, %c0_i32 : i32, i32
  }
  func.func @transform_14(%arg0: i32) -> (i32, i32) {
    %c0_i32 = arith.constant 0 : i32
    %c0_i32_0 = arith.constant 0 : i32
    return %arg0, %c0_i32 : i32, i32
  }
}

</mosaic_0001>

<bundles_post_ra>
// kernel: tpu_custom_call.1
= control target key start
LH: loop header
LB: loop body
LE: loop exit
PB: predicated region body
PF: predicated region fallthrough
CT: control target
= control target key end

     0   :  { %20 = vsyncpa [#allocation3], 0  ;;  %v783_v3 = vmov 0.0|0.0   ;;  %vm784_vm0 = vmmov 0   ;;  %v785_v11 = vmov 0.0   ;;  %s1038_s0 = inlined_call_operand.vmem [shape: f32[8,32], index: 0, kind: input, shape index: {}]   ;;  %s1039_s1 = inlined_call_operand.vmem [shape: f32[8,64], index: 1, kind: input, shape index: {}]   ;;  %s1040_s2 = inlined_call_operand.vmem [shape: f32[8,64], index: 2, kind: input, shape index: {}]   ;;  %s1041_s3 = inlined_call_operand.vmem [shape: f32[64,32], index: 3, kind: input, shape index: {}]   ;;  %s1042_s4 = inlined_call_operand.vmem [shape: f32[1,32], index: 4, kind: input, shape index: {}]   ;;  %s1043_s5 = inlined_call_operand.vmem [shape: f32[64,32], index: 5, kind: input, shape index: {}]   ;;  %s1044_s6 = inlined_call_operand.vmem [shape: f32[1,32], index: 6, kind: input, shape index: {}]   ;;  %s1045_s7 = inlined_call_operand.vmem [shape: f32[32,4], index: 7, kind: input, shape index: {}]   ;;  %s1046_s8 = inlined_call_operand.vmem [shape: f32[32,4], index: 8, kind: input, shape index: {}]   ;;  %s1047_s9 = inlined_call_operand.vmem [shape: f32[32,4], index: 9, kind: input, shape index: {}]   ;;  %s1048_s10 = inlined_call_operand.vmem [shape: f32[1,4], index: 10, kind: input, shape index: {}]   ;;  %s1049_s11 = inlined_call_operand.hbm [shape: f32[8,32], index: 11, kind: output, shape index: {0}]   ;;  %s1050_s12 = inlined_call_operand.hbm [shape: f32[8,32], index: 12, kind: output, shape index: {1}]   ;;  %s1051_s13 = inlined_call_operand.hbm [shape: f32[8,32], index: 13, kind: output, shape index: {2}]   ;;  %s1052_s14 = inlined_call_operand.vmem [shape: f32[8,4], index: 14, kind: output, shape index: {3}]  }
   0x1   :  { %v45_v0 = vld [vmem:[%s1041_s3] sm:$0xff]  ;;  %v46_v1 = vld [vmem:[%s1041_s3 + $0x8] sm:$0xff]  ;;  %655 = vmatprep.subr.bf16.mxu0 %v783_v3  ;;  %667 = vmatprep.subr.bf16.mxu1 %v783_v3  ;;  %v47_v6 = vld [vmem:[%s1041_s3 + $0x10] sm:$0xff] }
   0x2   :  { %v135_v2 = vld [vmem:[%s1043_s5] sm:$0xff]  ;;  %v656_v4 = vpack.c.bf16 %v46_v1, %v45_v0  ;;  %v136_v5 = vld [vmem:[%s1043_s5 + $0x8] sm:$0xff]  ;;  %v48_v7 = vld [vmem:[%s1041_s3 + $0x18] sm:$0xff]  ;;  %600 = vmatprep.mubr.msk.f32.mxu0 %vm784_vm0, %v785_v11  ;;  %619 = vmatprep.mubr.msk.f32.mxu1 %vm784_vm0, %v785_v11 }
   0x3   :  { %v668_v8 = vpack.c.bf16 %v136_v5, %v135_v2  ;;  %v137_v9 = vld [vmem:[%s1043_s5 + $0x10] sm:$0xff]  ;;  %v138_v10 = vld [vmem:[%s1043_s5 + $0x18] sm:$0xff]  ;;  %v659_v12 = vpack.c.bf16 %v48_v7, %v47_v6  ;;  %v49_v14 = vld [vmem:[%s1041_s3 + $0x20] sm:$0xff] }
   0x4   :  { %657 = vmatpush3.bf16.msra.mxu0 %v656_v4  ;;  %v671_v13 = vpack.c.bf16 %v138_v10, %v137_v9  ;;  %v50_v15 = vld [vmem:[%s1041_s3 + $0x28] sm:$0xff]  ;;  %v139_v16 = vld [vmem:[%s1043_s5 + $0x20] sm:$0xff] }
   0x5   :  { %669 = vmatpush3.bf16.msra.mxu1 %v668_v8  ;;  %658 = vmatprep.subr.bf16.mxu0 %v783_v3  ;;  %v140_v17 = vld [vmem:[%s1043_s5 + $0x28] sm:$0xff] }
   0x6   :  { %670 = vmatprep.subr.bf16.mxu1 %v783_v3 }
   0x7   :  { %21 = vsyncpa [#allocation5], 0  ;;  %v662_v18 = vpack.c.bf16 %v50_v15, %v49_v14  ;;  %v674_v19 = vpack.c.bf16 %v140_v17, %v139_v16  ;;  %v51_v20 = vld [vmem:[%s1041_s3 + $0x30] sm:$0xff]  ;;  %v52_v21 = vld [vmem:[%s1041_s3 + $0x38] sm:$0xff]  ;;  %vm60_vm1 = vcmask 523264   ;;  %vm225_vm2 = vcmask 261120  }
   0x8   :  { %660 = vmatpush3.bf16.msra.mxu0 %v659_v12  ;;  %v141_v22 = vld [vmem:[%s1043_s5 + $0x30] sm:$0xff]  ;;  %v142_v23 = vld [vmem:[%s1043_s5 + $0x38] sm:$0xff]  ;;  %v665_v24 = vpack.c.bf16 %v52_v21, %v51_v20  ;;  %v44_v26 = vld [vmem:[%s1039_s1] sm:$0xff] }
   0x9   :  { %672 = vmatpush3.bf16.msra.mxu1 %v671_v13  ;;  %661 = vmatprep.subr.bf16.mxu0 %v783_v3  ;;  %v677_v25 = vpack.c.bf16 %v142_v23, %v141_v22  ;;  %v134_v27 = vld [vmem:[%s1040_s2] sm:$0xff]  ;;  %v251_v44 = vld [vmem:[%s1046_s8 + $0x8] sm:$0xff]  ;;  %v252_v46 = vld [vmem:[%s1046_s8 + $0x10] sm:$0xff] }
   0xa   :  { %673 = vmatprep.subr.bf16.mxu1 %v783_v3  ;;  %v542_v28 = vld [vmem:[%s1042_s4] ss:$0 sm:$0xff]  ;;  %v253_v47 = vld [vmem:[%s1046_s8 + $0x18] sm:$0xff]  ;;  %v247_v50 = vld [vmem:[%s1045_s7 + $0x8] sm:$0xff]  ;;  %s787_s4 = smov [#allocation2]  }
   0xb   :  { %v544_v29 = vld [vmem:[%s1044_s6] ss:$0 sm:$0xff]  ;;  %v683_v48 = vpack.c.bf16 %v253_v47, %v252_v46  ;;  %v248_v52 = vld [vmem:[%s1045_s7 + $0x10] sm:$0xff]  ;;  %v249_v53 = vld [vmem:[%s1045_s7 + $0x18] sm:$0xff] }
   0xc   :  { %663 = vmatpush3.bf16.msra.mxu0 %v662_v18  ;;  %v223_v31 = vld [vmem:[%s1038_s0] sm:$0xff]  ;;  %v689_v54 = vpack.c.bf16 %v249_v53, %v248_v52  ;;  %v401_v62 = vld [vmem:[%s1047_s9 + $0x8] sm:$0xff]  ;;  %v402_v4 = vld [vmem:[%s1047_s9 + $0x10] sm:$0xff]  ;;  %s503_s0 = sshll.u32 %s787_s4, 4  ;;  %s504_s0 = int_to_ptr.vmem [resolvable:$true] %s503_s0 }
   0xd   :  { %675 = vmatpush3.bf16.msra.mxu1 %v674_v19  ;;  %664 = vmatprep.subr.bf16.mxu0 %v783_v3  ;;  %v224_v38 = vmul.f32 %v223_v31, %v223_v31  ;;  %v250_v43 = vld [vmem:[%s1046_s8] sm:$0xff]  ;;  %v403_v5 = vld [vmem:[%s1047_s9 + $0x18] sm:$0xff] }
   0xe   :  { %676 = vmatprep.subr.bf16.mxu1 %v783_v3  ;;  %v680_v45 = vpack.c.bf16 %v251_v44, %v250_v43  ;;  %v246_v49 = vld [vmem:[%s1045_s7] sm:$0xff]  ;;  %v695_v8 = vpack.c.bf16 %v403_v5, %v402_v4 }
   0xf   :  { %v226_v42 = vsel %vm225_vm2, %v224_v38, 0.0  ;;  %v686_v51 = vpack.c.bf16 %v247_v50, %v246_v49  ;;  %v400_v61 = vld [vmem:[%s1047_s9] sm:$0xff]  ;;  %s786_s9 = smov [#allocation4]  }
  0x10   :  { %666 = vmatpush3.bf16.msra.mxu0 %v665_v24  ;;  %v692_v0 = vpack.c.bf16 %v401_v62, %v400_v61  ;;  %s513_s18 = sshll.u32 %s786_s9, 4  ;;  %s514_s18 = int_to_ptr.vmem [resolvable:$true] %s513_s18 }
  0x11   :  { %678 = vmatpush3.bf16.msra.mxu1 %v677_v25  ;;  %679 = vmatprep.subr.bf16.mxu0 %v783_v3  ;;  %s713_s6 = scalar_lea.vmem %s514_s18, 128  ;;  %p718_p1 = scmp.lt.s32.totalorder %s514_s18, %s514_s18 }
  0x12   :  { %685 = vmatprep.subr.bf16.mxu1 %v783_v3  ;;  %p714_p0 = scmp.ne.s32.totalorder %s514_s18, %s713_s6  ;;  %p719_p2 = scmp.lt.s32.totalorder %s713_s6, %s713_s6 }
  0x13   :  { %601 = vmatmul.mubr.msk.f32.vlgmr.msra.gmra.mrb[0].mxu0 %vm60_vm1, %v44_v26 }
  0x14   :  { %620 = vmatmul.mubr.msk.f32.vlgmr.msra.gmra.mrb[0].mxu1 %vm60_vm1, %v134_v27  ;;  %630 = vmatprep.mubr.msk.f32.mxu0 %vm784_vm0, %v785_v11  ;;  %p720_p3 = por %p719_p2, %p718_p1 }
  0x15   :  { %641 = vmatprep.mubr.msk.f32.mxu1 %vm784_vm0, %v785_v11  ;;  %681 = vmatpush3.bf16.msra.mxu0 %v680_v45 }
  0x16   :  { %682 = vmatprep.subr.bf16.mxu0 %v783_v3  ;;  %687 = vmatpush3.bf16.msra.mxu1 %v686_v51  ;;  %p721_p4 = pnand %p720_p3, %p714_p0 }
  0x17   :  { %688 = vmatprep.subr.bf16.mxu1 %v783_v3 }
  0x19   :  { %684 = vmatpush3.bf16.msra.mxu0 %v683_v48 }
  0x1a   :  { %691 = vmatprep.subr.bf16.mxu0 %v783_v3  ;;  %690 = vmatpush3.bf16.msra.mxu1 %v689_v54 }
  0xe6   :  { %v130_v30 = vpop.f32.mrb[0].mxu0 }
  0xe7   :  { %v131_v32 = vadd.f32 %v542_v28, %v130_v30  ;;  %v219_v33 = vpop.f32.mrb[0].mxu1  ;;  %v602_v34 = vpop.f32.mrb[1].mxu0 }
  0xe8   :  { %v220_v35 = vadd.f32 %v544_v29, %v219_v33  ;;  %v621_v36 = vpop.f32.mrb[1].mxu1 }
  0xe9   :  { %v232_v37 = vmul.f32 %v131_v32, %v131_v32 }
  0xea   :  { %v239_v39 = vmul.f32 %v220_v35, %v220_v35 }
  0xeb   :  { %v233_v40 = vsel %vm225_vm2, %v232_v37, 0.0 }
  0xec   :  { %v240_v41 = vsel %vm225_vm2, %v239_v39, 0.0  ;;  %234 = vadd.xlane.f32.xlu0 %v233_v40 }
  0xed   :  { %241 = vadd.xlane.f32.xlu1 %v240_v41 }
  0xf0   :  { %227 = vadd.xlane.f32.xlu0 %v226_v42 }
 0x179   :  { %v235_v55 = vpop.xlane.xlu0 %234 }
 0x17a   :  { %v242_v56 = vpop.xlane.xlu1 %241  ;;  %v236_v57 = vmax.f32 %v235_v55, 1e-24 }
 0x17b   :  { %v243_v58 = vmax.f32 %v242_v56, 1e-24 }
 0x17c   :  { %703 = vrsqrt.f32 %v236_v57 }
 0x17d   :  { %705 = vrsqrt.f32 %v243_v58  ;;  %v228_v59 = vpop.xlane.xlu0 %227 }
 0x17e   :  { %v229_v60 = vmax.f32 %v228_v59, 1e-24 }
 0x180   :  { %707 = vrsqrt.f32 %v229_v60 }
 0x186   :  { %v704_v63 = vpop.eup %703 }
 0x187   :  { %v706_v1 = vpop.eup %705  ;;  %v238_v2 = vmul.f32 %v704_v63, %v131_v32 }
 0x188   :  { %v245_v6 = vmul.f32 %v706_v1, %v220_v35 }
 0x189   :  { %631 = vmatmul.mubr.msk.f32.vlgmr.msra.gmra.mrb[2].mxu0 %vm225_vm2, %v238_v2  ;;  %493 = vst.msk [vmem:[#allocation4] sm:$0xff] %vm225_vm2, %v238_v2 }
 0x18a   :  { %v708_v7 = vpop.eup %707  ;;  %494 = vst.msk [vmem:[#allocation6] sm:$0xff] %vm225_vm2, %v245_v6  ;;  %693 = vmatpush3.bf16.msra.mxu0 %v692_v0  ;;  %652 = vmatprep.mubr.msk.f32.mxu0 %vm784_vm0, %v785_v11 }
 0x18b   :  { %v231_v9 = vmul.f32 %v708_v7, %v223_v31  ;;  %694 = vmatprep.subr.bf16.mxu0 %v783_v3 }
 0x18d   :  { %492 = vst.msk [vmem:[#allocation2] sm:$0xff] %vm225_vm2, %v231_v9  ;;  %642 = vmatmul.mubr.msk.f32.vlgmr.msra.gmra.mrb[2].mxu1 %vm225_vm2, %v231_v9 }
 0x18e   :  { %696 = vmatpush3.bf16.msra.mxu0 %v695_v8 }
 0x191   :  { %653 = vmatmul.mubr.msk.f32.vlgmr.msra.gmra.mrb[4].mxu0 %vm225_vm2, %v245_v6 }
 0x192   :  { %724 = shalt.err (!%p721_p4)
}
 0x193   :  { %s725_s21 = scalar_lea.hbm %s1050_s12, 128 }
 0x194   :  { %p726_p5 = scmp.ne.s32.totalorder %s1050_s12, %s725_s21  ;;  %p729_p6 = scmp.lt.u32.totalorder %s725_s21, %s1050_s12 }
 0x196   :  { %p731_p7 = pnand %p729_p6, %p726_p5 }
 0x198   :  { %734 = shalt.err (!%p731_p7)
}
 0x199   :  { %516 = dma.vmem_to_hbm [thread:$0]  %s514_s18, 128, %s1050_s12, [#allocation5]  }
 0x19a   :  { %s735_s28 = scalar_lea.vmem %s504_s0, 128  ;;  %p740_p9 = scmp.lt.s32.totalorder %s504_s0, %s504_s0 }
 0x19b   :  { %p736_p8 = scmp.ne.s32.totalorder %s504_s0, %s735_s28  ;;  %p741_p10 = scmp.lt.s32.totalorder %s735_s28, %s735_s28 }
 0x19d   :  { %p742_p11 = por %p741_p10, %p740_p9 }
 0x19f   :  { %p743_p12 = pnand %p742_p11, %p736_p8 }
 0x1a1   :  { %746 = shalt.err (!%p743_p12)
}
 0x1a2   :  { %s747_s29 = scalar_lea.hbm %s1049_s11, 128 }
 0x1a3   :  { %p748_p13 = scmp.ne.s32.totalorder %s1049_s11, %s747_s29  ;;  %p751_p0 = scmp.lt.u32.totalorder %s747_s29, %s1049_s11 }
 0x1a5   :  { %p753_p1 = pnand %p751_p0, %p748_p13 }
 0x1a7   :  { %756 = shalt.err (!%p753_p1)
}
 0x1a8   :  { %506 = dma.vmem_to_hbm [thread:$0]  %s504_s0, 128, %s1049_s11, [#allocation3]  }
 0x1a9   :  { %s788_s16 = smov [#allocation6]  }
 0x1aa   :  { %s523_s17 = sshll.u32 %s788_s16, 4  ;;  %s524_s17 = int_to_ptr.vmem [resolvable:$true] %s523_s17 }
 0x1ab   :  { %s757_s2 = scalar_lea.vmem %s524_s17, 128  ;;  %p762_p3 = scmp.lt.s32.totalorder %s524_s17, %s524_s17 }
 0x1ac   :  { %p758_p2 = scmp.ne.s32.totalorder %s524_s17, %s757_s2  ;;  %p763_p4 = scmp.lt.s32.totalorder %s757_s2, %s757_s2 }
 0x1ae   :  { %p764_p5 = por %p763_p4, %p762_p3 }
 0x1b0   :  { %p765_p6 = pnand %p764_p5, %p758_p2 }
 0x1b2   :  { %768 = shalt.err (!%p765_p6)
}
 0x1b3   :  { %s769_s4 = scalar_lea.hbm %s1051_s13, 128 }
 0x1b4   :  { %p770_p7 = scmp.ne.s32.totalorder %s1051_s13, %s769_s4  ;;  %p773_p8 = scmp.lt.u32.totalorder %s769_s4, %s1051_s13 }
 0x1b6   :  { %p775_p9 = pnand %p773_p8, %p770_p7 }
 0x1b8   :  { %778 = shalt.err (!%p775_p9)
}
 0x1b9   :  { %526 = dma.vmem_to_hbm [thread:$0]  %s524_s17, 128, %s1051_s13, [#allocation5]   ;;  %v549_v15 = vld [vmem:[%s1048_s10] ss:$0 sm:$0xff]  ;;  %vm495_vm3 = vcmask 31744  }
 0x25c   :  { %v323_v3 = vpop.f32.mrb[2].mxu0 }
 0x25d   :  { %v632_v10 = vpop.f32.mrb[3].mxu0 }
 0x260   :  { %v396_v11 = vpop.f32.mrb[2].mxu1 }
 0x261   :  { %v397_v12 = vadd.f32 %v396_v11, %v323_v3  ;;  %v643_v13 = vpop.f32.mrb[3].mxu1 }
 0x264   :  { %v473_v14 = vpop.f32.mrb[4].mxu0 }
 0x265   :  { %v477_v16 = vadd.f32 %v473_v14, %v397_v12  ;;  %v654_v17 = vpop.f32.mrb[5].mxu0 }
 0x267   :  { %v485_v18 = vadd.f32 %v549_v15, %v477_v16 }
 0x269   :  { %v550_v19 = vmul.f32 -1.442695, %v485_v18 }
 0x26b   :  { %709 = vpow2.f32 %v550_v19 }
 0x275   :  { %v710_v20 = vpop.eup %709 }
 0x276   :  { %v489_v21 = vadd.f32 1.0, %v710_v20 }
 0x278   :  { %711 = vrcp.f32 %v489_v21 }
 0x282   :  { %v712_v22 = vpop.eup %711 }
 0x283   :  { %496 = vst.msk [vmem:[%s1052_s14] sm:$0xff] %vm495_vm3, %v712_v22 }
 0x284   :  { %779 = dma.done.wait [#allocation3], 128  }
 0x285   :  { %780 = vsyncadd [#allocation3], 4294967168 }
 0x286   :  { %781 = dma.done.wait [#allocation5], 256  }
 0x287   :  { %782 = vsyncadd [#allocation5], 4294967040 }
 0x288   :  { %540 = vsyncpa [#allocation3], 1 }
 0x289   :  { %541 = vsyncpa [#allocation5], 1 }

</bundles_post_ra>
